<compile_context>
chip_gen: v5e
topology: v5e:2x2
jax: 0.10.0
libtpu: 0.0.40
codegen_flags: <defaults>
</compile_context>

<pallas_src>
import functools

import jax
import jax.numpy as jnp
from jax import lax
from jax.experimental import pallas as pl
from jax.experimental.pallas import tpu as pltpu

D_IN, D_H1, D_H2, D_OUT = 5, 8, 4, 12


def mlp_kernel(x_ref, w1_ref, b1_ref, w2_ref, b2_ref, w3_ref, b3_ref, o_ref,
               *, compute_dtype):
    """One batch tile, fully fused Linear->ReLU x3.

    x_ref:  (TB, 5) in the caller's dtype (cast in-register below).
    w*_ref: (out, in) weights in compute dtype; b*_ref: (1, out) f32.
    o_ref:  (TB, 12).

    Batch-major throughout: each MXU result is already in the layout the next
    matmul / final store needs, so there are zero transposes.  MXU accumulates
    in f32; bias + ReLU stay in f32 registers.  Padded rows of a partial last
    tile only affect their own (dropped) output rows, since every op here is
    row-independent along the batch axis.
    """
    x = x_ref[...].astype(compute_dtype)                     # free VPU cast
    # Layer 1: (TB,5) . (8,5)^T -> (TB,8)
    h = lax.dot_general(x, w1_ref[...],
                        dimension_numbers=(((1,), (1,)), ((), ())),
                        preferred_element_type=jnp.float32)
    h = jnp.maximum(h + b1_ref[...], 0.0)
    # Layer 2: (TB,8) . (4,8)^T -> (TB,4)
    h = lax.dot_general(h.astype(compute_dtype), w2_ref[...],
                        dimension_numbers=(((1,), (1,)), ((), ())),
                        preferred_element_type=jnp.float32)
    h = jnp.maximum(h + b2_ref[...], 0.0)
    # Layer 3: (TB,4) . (12,4)^T -> (TB,12)
    h = lax.dot_general(h.astype(compute_dtype), w3_ref[...],
                        dimension_numbers=(((1,), (1,)), ((), ())),
                        preferred_element_type=jnp.float32)
    h = jnp.maximum(h + b3_ref[...], 0.0)
    o_ref[...] = h.astype(o_ref.dtype)                       # direct (TB,12) store


@functools.partial(jax.jit,
                   static_argnames=("tile_b", "compute_dtype", "out_dtype"))
def simple_model_forward(x, params, *, tile_b=4096,
                         compute_dtype=jnp.float32, out_dtype=None):
    """x: (B, 5) -> (B, 12). Matches PyTorch SimpleModel.forward semantics.

    bf16 compute/out dtypes trade ~1e-2-level divergence from the f32
    reference for roughly half the HBM traffic.
    """
    w1, b1, w2, b2, w3, b3 = params
    B, d_in = x.shape
    assert d_in == D_IN, x.shape
    out_dt = jnp.dtype(x.dtype if out_dtype is None else out_dtype)
    cd = jnp.dtype(compute_dtype)

    # Batch tile selection: big tiles (bandwidth-bound kernel; per-step grid
    # overhead ~0.35us), multiples of 128, and >=2 tiles whenever possible so
    # the "parallel" axis can shard across both TensorCores on v7x.
    if B > tile_b:
        tb = max(128, (tile_b // 128) * 128)
    elif B >= 256:
        tb = max(128, (B // 2 // 128) * 128)
    else:
        tb = B
    grid = (pl.cdiv(B, tb),)

    # Tiny resident params: wrapper-side cast/reshape is negligible.
    # x itself is NOT cast here (would be an extra HBM pass); kernel casts
    # each tile in-register.
    w1c, w2c, w3c = (w.astype(cd) for w in (w1, w2, w3))
    b1r, b2r, b3r = (b.reshape(1, -1).astype(jnp.float32) for b in (b1, b2, b3))

    param_bytes = sum(int(a.size) * a.dtype.itemsize
                      for a in (w1c, b1r, w2c, b2r, w3c, b3r))
    cost = pl.CostEstimate(
        flops=2 * B * (D_IN * D_H1 + D_H1 * D_H2 + D_H2 * D_OUT),
        transcendentals=0,
        bytes_accessed=(B * D_IN * x.dtype.itemsize
                        + B * D_OUT * out_dt.itemsize
                        + param_bytes),
    )

    # (tb, 5)/(tb, 12) blocks lane-pad to 128 f32 lanes in VMEM; budget for the
    # double-buffered I/O blocks plus in-kernel temporaries, capped below v7x's
    # 64 MiB physical VMEM.
    per_buf = tb * 128 * 4
    vmem_limit = int(min(60 << 20, max(32 << 20, 10 * per_buf)))

    resident = lambda i: (0, 0)   # weights/biases: same block every grid step
    kernel = functools.partial(mlp_kernel, compute_dtype=cd)
    out = pl.pallas_call(
        kernel,
        out_shape=jax.ShapeDtypeStruct((B, D_OUT), out_dt),
        grid=grid,
        in_specs=[
            pl.BlockSpec((tb, D_IN), lambda i: (i, 0)),    # x: tiled over batch
            pl.BlockSpec((D_H1, D_IN), resident),          # w1 (8, 5)
            pl.BlockSpec((1, D_H1), resident),             # b1 (1, 8)
            pl.BlockSpec((D_H2, D_H1), resident),          # w2 (4, 8)
            pl.BlockSpec((1, D_H2), resident),             # b2 (1, 4)
            pl.BlockSpec((D_OUT, D_H2), resident),         # w3 (12, 4)
            pl.BlockSpec((1, D_OUT), resident),            # b3 (1, 12)
        ],
        out_specs=pl.BlockSpec((tb, D_OUT), lambda i: (i, 0)),
        compiler_params=pltpu.CompilerParams(
            dimension_semantics=("parallel",),
            vmem_limit_bytes=vmem_limit),
        cost_estimate=cost,
    )(x, w1c, b1r, w2c, b2r, w3c, b3r)
    return out


def init_params(key):
    """PyTorch-style Linear init: W is (out, in), b is (out,), U(+-1/sqrt(in))."""
    dims = [(D_IN, D_H1), (D_H1, D_H2), (D_H2, D_OUT)]
    params = []
    for i, (fan_in, fan_out) in enumerate(dims):
        kw, kb = jax.random.split(jax.random.fold_in(key, i))
        bound = 1.0 / (fan_in ** 0.5)
        w = jax.random.uniform(kw, (fan_out, fan_in), jnp.float32, -bound, bound)
        b = jax.random.uniform(kb, (fan_out,), jnp.float32, -bound, bound)
        params += [w, b]
    return tuple(params)


def reference_forward(x, params):
    w1, b1, w2, b2, w3, b3 = params
    h = jnp.maximum(x @ w1.T + b1, 0.0)
    h = jnp.maximum(h @ w2.T + b2, 0.0)
    h = jnp.maximum(h @ w3.T + b3, 0.0)
    return h


if __name__ == "__main__":
    key = jax.random.PRNGKey(0)
    params = init_params(key)

    # 1) Spec-scale f32 run (batch=8): single tile, tight correctness check.
    x_small = jax.random.normal(jax.random.fold_in(key, 100), (8, D_IN), jnp.float32)
    out_small = jax.block_until_ready(simple_model_forward(x_small, params))
    ref_small = reference_forward(x_small, params)
    assert out_small.shape == (8, D_OUT), out_small.shape
    assert out_small.dtype == x_small.dtype
    assert jnp.allclose(out_small, ref_small, atol=1e-5, rtol=1e-5), "f32 mismatch"

    # 2) Multi-tile f32 runs: default tiling splits B=384 into 3x128 tiles
    #    (>=2-tile v7x branch); tile_b=256 forces a partial last tile.
    x_mid = jax.random.normal(jax.random.fold_in(key, 200), (384, D_IN), jnp.float32)
    ref_mid = reference_forward(x_mid, params)
    for kwargs in ({}, {"tile_b": 256}):
        out_mid = jax.block_until_ready(simple_model_forward(x_mid, params, **kwargs))
        assert out_mid.shape == (384, D_OUT), out_mid.shape
        assert jnp.allclose(out_mid, ref_mid, atol=1e-5, rtol=1e-5), \
            f"f32 multi-tile mismatch ({kwargs})"

    # 3) bf16 compute + bf16 output (halved HBM traffic path); loose tolerance.
    out_bf16 = jax.block_until_ready(
        simple_model_forward(x_mid, params, tile_b=256,
                             compute_dtype=jnp.bfloat16, out_dtype=jnp.bfloat16))
    assert out_bf16.shape == (384, D_OUT), out_bf16.shape
    assert out_bf16.dtype == jnp.bfloat16
    assert jnp.allclose(out_bf16.astype(jnp.float32), ref_mid,
                        atol=5e-2, rtol=5e-2), "bf16 mismatch"

    print("KERNEL_OK")
</pallas_src>

<mosaic_0001>
module attributes {stable_mosaic.version = 11 : i64} {
  func.func @mlp_kernel(%arg0: i32, %arg1: memref<8x5xf32, #tpu.memory_space<vmem>>, %arg2: memref<8x5xf32, #tpu.memory_space<vmem>>, %arg3: memref<1x8xf32, #tpu.memory_space<vmem>>, %arg4: memref<4x8xf32, #tpu.memory_space<vmem>>, %arg5: memref<1x4xf32, #tpu.memory_space<vmem>>, %arg6: memref<12x4xf32, #tpu.memory_space<vmem>>, %arg7: memref<1x12xf32, #tpu.memory_space<vmem>>, %arg8: memref<8x12xf32, #tpu.memory_space<vmem>>) attributes {dimension_semantics = [#tpu.dimension_semantics<parallel>], iteration_bounds = array<i64: 1>, scalar_prefetch = 0 : i64, scratch_operands = 0 : i64, tpu.core_type = #tpu.core_type<tc>, window_params = [{transform_indices = @transform_0, window_bounds = array<i64: 8, 5>}, {pipeline_mode = #tpu.pipeline_mode<synchronous>, transform_indices = @transform_1, window_bounds = array<i64: 8, 5>}, {pipeline_mode = #tpu.pipeline_mode<synchronous>, transform_indices = @transform_2, window_bounds = array<i64: 1, 8>}, {pipeline_mode = #tpu.pipeline_mode<synchronous>, transform_indices = @transform_3, window_bounds = array<i64: 4, 8>}, {pipeline_mode = #tpu.pipeline_mode<synchronous>, transform_indices = @transform_4, window_bounds = array<i64: 1, 4>}, {pipeline_mode = #tpu.pipeline_mode<synchronous>, transform_indices = @transform_5, window_bounds = array<i64: 12, 4>}, {pipeline_mode = #tpu.pipeline_mode<synchronous>, transform_indices = @transform_6, window_bounds = array<i64: 1, 12>}, {transform_indices = @transform_7, window_bounds = array<i64: 8, 12>}]} {
    %c0 = arith.constant 0 : index
    %c0_0 = arith.constant 0 : index
    %0 = vector.load %arg1[%c0, %c0_0] : memref<8x5xf32, #tpu.memory_space<vmem>>, vector<8x5xf32>
    %c0_1 = arith.constant 0 : index
    %c0_2 = arith.constant 0 : index
    %1 = vector.load %arg2[%c0_1, %c0_2] : memref<8x5xf32, #tpu.memory_space<vmem>>, vector<8x5xf32>
    %cst = arith.constant dense<0.000000e+00> : vector<8x8xf32>
    %2 = tpu.matmul %0, %1, %cst {dimension_numbers = #tpu.dot_dimension_numbers<[1], [1], [0], [0], [0, 0, 1, 0], [], []>} : vector<8x5xf32>, vector<8x5xf32>, vector<8x8xf32> -> vector<8x8xf32>
    %c0_3 = arith.constant 0 : index
    %c0_4 = arith.constant 0 : index
    %3 = vector.load %arg3[%c0_3, %c0_4] : memref<1x8xf32, #tpu.memory_space<vmem>>, vector<1x8xf32>
    %4 = vector.broadcast %3 : vector<1x8xf32> to vector<8x8xf32>
    %5 = arith.addf %2, %4 : vector<8x8xf32>
    %cst_5 = arith.constant 0.000000e+00 : f32
    %6 = vector.broadcast %cst_5 : f32 to vector<8x8xf32>
    %7 = arith.maximumf %5, %6 : vector<8x8xf32>
    %c0_6 = arith.constant 0 : index
    %c0_7 = arith.constant 0 : index
    %8 = vector.load %arg4[%c0_6, %c0_7] : memref<4x8xf32, #tpu.memory_space<vmem>>, vector<4x8xf32>
    %cst_8 = arith.constant dense<0.000000e+00> : vector<8x4xf32>
    %9 = tpu.matmul %7, %8, %cst_8 {dimension_numbers = #tpu.dot_dimension_numbers<[1], [1], [0], [0], [0, 0, 1, 0], [], []>} : vector<8x8xf32>, vector<4x8xf32>, vector<8x4xf32> -> vector<8x4xf32>
    %c0_9 = arith.constant 0 : index
    %c0_10 = arith.constant 0 : index
    %10 = vector.load %arg5[%c0_9, %c0_10] : memref<1x4xf32, #tpu.memory_space<vmem>>, vector<1x4xf32>
    %11 = vector.broadcast %10 : vector<1x4xf32> to vector<8x4xf32>
    %12 = arith.addf %9, %11 : vector<8x4xf32>
    %cst_11 = arith.constant 0.000000e+00 : f32
    %13 = vector.broadcast %cst_11 : f32 to vector<8x4xf32>
    %14 = arith.maximumf %12, %13 : vector<8x4xf32>
    %c0_12 = arith.constant 0 : index
    %c0_13 = arith.constant 0 : index
    %15 = vector.load %arg6[%c0_12, %c0_13] : memref<12x4xf32, #tpu.memory_space<vmem>>, vector<12x4xf32>
    %cst_14 = arith.constant dense<0.000000e+00> : vector<8x12xf32>
    %16 = tpu.matmul %14, %15, %cst_14 {dimension_numbers = #tpu.dot_dimension_numbers<[1], [1], [0], [0], [0, 0, 1, 0], [], []>} : vector<8x4xf32>, vector<12x4xf32>, vector<8x12xf32> -> vector<8x12xf32>
    %c0_15 = arith.constant 0 : index
    %c0_16 = arith.constant 0 : index
    %17 = vector.load %arg7[%c0_15, %c0_16] : memref<1x12xf32, #tpu.memory_space<vmem>>, vector<1x12xf32>
    %18 = vector.broadcast %17 : vector<1x12xf32> to vector<8x12xf32>
    %19 = arith.addf %16, %18 : vector<8x12xf32>
    %cst_17 = arith.constant 0.000000e+00 : f32
    %20 = vector.broadcast %cst_17 : f32 to vector<8x12xf32>
    %21 = arith.maximumf %19, %20 : vector<8x12xf32>
    %c0_18 = arith.constant 0 : index
    %c0_19 = arith.constant 0 : index
    %22 = vector.load %arg8[%c0_18, %c0_19] : memref<8x12xf32, #tpu.memory_space<vmem>>, vector<8x12xf32>
    tpu.vector_store %arg8[%c0_18, %c0_19], %21 {strides = array<i32>} : memref<8x12xf32, #tpu.memory_space<vmem>>, vector<8x12xf32>,
    return
  }
  func.func @transform_0(%arg0: i32) -> (i32, i32) {
    %c0_i32 = arith.constant 0 : i32
    %c0_i32_0 = arith.constant 0 : i32
    return %arg0, %c0_i32 : i32, i32
  }
  func.func @transform_1(%arg0: i32) -> (i32, i32) {
    %c0_i32 = arith.constant 0 : i32
    %c0_i32_0 = arith.constant 0 : i32
    %c0_i32_1 = arith.constant 0 : i32
    return %c0_i32, %c0_i32_0 : i32, i32
  }
  func.func @transform_2(%arg0: i32) -> (i32, i32) {
    %c0_i32 = arith.constant 0 : i32
    %c0_i32_0 = arith.constant 0 : i32
    %c0_i32_1 = arith.constant 0 : i32
    return %c0_i32, %c0_i32_0 : i32, i32
  }
  func.func @transform_3(%arg0: i32) -> (i32, i32) {
    %c0_i32 = arith.constant 0 : i32
    %c0_i32_0 = arith.constant 0 : i32
    %c0_i32_1 = arith.constant 0 : i32
    return %c0_i32, %c0_i32_0 : i32, i32
  }
  func.func @transform_4(%arg0: i32) -> (i32, i32) {
    %c0_i32 = arith.constant 0 : i32
    %c0_i32_0 = arith.constant 0 : i32
    %c0_i32_1 = arith.constant 0 : i32
    return %c0_i32, %c0_i32_0 : i32, i32
  }
  func.func @transform_5(%arg0: i32) -> (i32, i32) {
    %c0_i32 = arith.constant 0 : i32
    %c0_i32_0 = arith.constant 0 : i32
    %c0_i32_1 = arith.constant 0 : i32
    return %c0_i32, %c0_i32_0 : i32, i32
  }
  func.func @transform_6(%arg0: i32) -> (i32, i32) {
    %c0_i32 = arith.constant 0 : i32
    %c0_i32_0 = arith.constant 0 : i32
    %c0_i32_1 = arith.constant 0 : i32
    return %c0_i32, %c0_i32_0 : i32, i32
  }
  func.func @transform_7(%arg0: i32) -> (i32, i32) {
    %c0_i32 = arith.constant 0 : i32
    %c0_i32_0 = arith.constant 0 : i32
    return %arg0, %c0_i32 : i32, i32
  }
}

</mosaic_0001>

<bundles_post_ra>
// kernel: simple_model_forward.1
= control target key start
LH: loop header
LB: loop body
LE: loop exit
PB: predicated region body
PF: predicated region fallthrough
CT: control target
= control target key end

     0   :  { %vm33_vm0 = vcmask 39936   ;;  %s254_s0 = inlined_call_operand.vmem [shape: f32[8,5], index: 0, kind: input, shape index: {}]   ;;  %s255_s1 = inlined_call_operand.vmem [shape: f32[8,5], index: 1, kind: input, shape index: {}]   ;;  %s256_s2 = inlined_call_operand.vmem [shape: f32[1,8], index: 2, kind: input, shape index: {}]   ;;  %s257_s3 = inlined_call_operand.vmem [shape: f32[4,8], index: 3, kind: input, shape index: {}]   ;;  %s258_s4 = inlined_call_operand.vmem [shape: f32[1,4], index: 4, kind: input, shape index: {}]   ;;  %s259_s5 = inlined_call_operand.vmem [shape: f32[12,4], index: 5, kind: input, shape index: {}]   ;;  %s260_s6 = inlined_call_operand.vmem [shape: f32[1,12], index: 6, kind: input, shape index: {}]   ;;  %s261_s7 = inlined_call_operand.hbm [shape: f32[8,12], index: 7, kind: output, shape index: {}]  }
   0x1   :  { %v28_v0 = vld [vmem:[%s255_s1] sm:$0xff] }
   0x2   :  { %149 = vmatpush.xpose.msk.msra.mxu0 %vm33_vm0, %v28_v0  ;;  %v27_v1 = vld [vmem:[%s254_s0] sm:$0xff] }
   0x3   :  { %12 = vsyncpa [#allocation3], 0  ;;  %v61_v2 = vld [vmem:[%s257_s3] sm:$0xf]  ;;  %vm66_vm1 = vcmask 64512   ;;  %vm100_vm2 = vcmask 31744  }
   0x4   :  { %151 = vmatpush.xpose.msk.msra.mxu1 %vm66_vm1, %v61_v2  ;;  %v95_v3 = vld [vmem:[%s259_s5 + $0x8] sm:$0xf]  ;;  %v157_v4 = vld [vmem:[%s256_s2] ss:$0 sm:$0xff]  ;;  %s186_s2 = smov [#allocation2]   ;;  %vm131_vm3 = vcmask 97280  }
   0x5   :  { %150 = vmatmul.msk.f32.vlgmr.msra.gmra.mxu0 %vm33_vm0, %v27_v1  ;;  %153 = vmatpush.xpose.msk.msra.mxu2 %vm100_vm2, %v95_v3  ;;  %v94_v8 = vld [vmem:[%s259_s5] sm:$0xff]  ;;  %s138_s14 = sshll.u32 %s186_s2, 4  ;;  %s140_s5 = sshll.u32 %s261_s7, 4  ;;  %s139_s14 = int_to_ptr.vmem [resolvable:$true] %s138_s14  ;;  %s141_s5 = int_to_ptr.hbm [resolvable:$true] %s140_s5 }
   0x6   :  { %v158_v9 = vld [vmem:[%s258_s4] ss:$0 sm:$0xff] }
   0x7   :  { %v159_v13 = vld [vmem:[%s260_s6] ss:$0 sm:$0xff] }
   0x9   :  { %154 = vmatpush.xpose.msk.msra.mxu2 %vm100_vm2, %v94_v8 }
  0x82   :  { %v57_v5 = vpop.f32.mrf.mxu0 }
  0x83   :  { %v58_v6 = vadd.f32 %v157_v4, %v57_v5 }
  0x85   :  { %v60_v7 = vmax.f32 %v58_v6, 0.0 }
  0x87   :  { %152 = vmatmul.msk.f32.vlgmr.msra.gmra.mxu1 %vm66_vm1, %v60_v7 }
 0x104   :  { %v90_v10 = vpop.f32.mrf.mxu1 }
 0x105   :  { %v91_v11 = vadd.f32 %v158_v9, %v90_v10 }
 0x107   :  { %v93_v12 = vmax.f32 %v91_v11, 0.0 }
 0x109   :  { %155 = vmatmul.msk.f32.vlgmr.msra.gmra.mxu2 %vm100_vm2, %v93_v12 }
 0x18c   :  { %v127_v14 = vpop.f32.mrf.mxu2 }
 0x18d   :  { %v128_v15 = vadd.f32 %v159_v13, %v127_v14 }
 0x18f   :  { %v130_v16 = vmax.f32 %v128_v15, 0.0 }
 0x191   :  { %132 = vst.msk [vmem:[#allocation2] sm:$0xff] %vm131_vm3, %v130_v16 }
 0x192   :  { %143 = dma.vmem_to_hbm [thread:$0]  %s139_s14, 128, %s141_s5, [#allocation3]  }
 0x193   :  { %184 = dma.done.wait [#allocation3], 128  }
 0x194   :  { %185 = vsyncadd [#allocation3], 4294967168 }
 0x195   :  { %148 = vsyncpa [#allocation3], 1 }

</bundles_post_ra>
